<compile_context>
chip_gen: v7x
topology: tpu7x:2x2x1
jax: 0.10.0
libtpu: 0.0.40
codegen_flags: <defaults>
</compile_context>

<pallas_src>
import jax
import jax.numpy as jnp
from jax import lax
from jax.experimental import pallas as pl
from jax.experimental.pallas import tpu as pltpu


def _round_up(x, m):
    return ((x + m - 1) // m) * m


def _mlp_kernel(x_ref, w1_ref, b1_ref, w2_ref, b2_ref, o_ref):
    # fc1: h = relu(x @ W1.T + b1).  W1 is kept in nn.Linear (out, in) layout;
    # contracting the last dims of both operands avoids any wrapper transpose.
    h = lax.dot_general(
        x_ref[...], w1_ref[...],
        dimension_numbers=(((1,), (1,)), ((), ())),
        preferred_element_type=jnp.float32)
    h = jnp.maximum(h + b1_ref[...], 0.0)
    # fc2: o = relu(h @ W2p.T + b2p).  W2p is zero-padded to a 128-multiple of
    # output rows so this store is a full-lane (unmasked) vst.
    o = lax.dot_general(
        h, w2_ref[...],
        dimension_numbers=(((1,), (1,)), ((), ())),
        preferred_element_type=jnp.float32)
    o_ref[...] = jnp.maximum(o + b2_ref[...], 0.0).astype(o_ref.dtype)


def prepare_params(fc1_w, fc1_b, fc2_w, fc2_b):
    """One-time parameter prep — call ONCE, outside the per-step forward path.

    Keeps the PyTorch nn.Linear (out_features, in_features) layout (no
    transposes) and zero-pads fc2's output rows to a multiple of 128 so the
    kernel output is lane-dense.  Returns (w1, b1, w2_padded, b2_padded,
    output_dim).
    """
    hidden_dim, input_dim = fc1_w.shape
    output_dim, hd2 = fc2_w.shape
    assert hd2 == hidden_dim
    out_pad = 128 * pl.cdiv(output_dim, 128)
    w2p = jnp.zeros((out_pad, hidden_dim), fc2_w.dtype).at[:output_dim, :].set(fc2_w)
    b2p = jnp.zeros((out_pad,), fc2_b.dtype).at[:output_dim].set(fc2_b)
    return (fc1_w,
            fc1_b.reshape(1, hidden_dim),
            w2p,
            b2p.reshape(1, out_pad),
            output_dim)


def mlp_forward(x, w1, b1, w2p, b2p, output_dim, *,
                block_b=512, vmem_limit_bytes=32 * 1024 * 1024):
    """Run the fused MLP kernel on pre-prepared params.

    x: (B, input_dim) f32.  Returns (B, output_dim) f32.
    """
    B, input_dim = x.shape
    hidden_dim = w1.shape[0]
    out_pad = w2p.shape[0]

    # Tile the batch so x/o DMAs pipeline and (on v7x) the two TCs share the
    # grid.  TB is a multiple of 8 (sublane) or the full (small) batch.
    tb = min(block_b, _round_up(B, 8))
    b_padded = _round_up(B, tb)
    if b_padded != B:
        x = jnp.pad(x, ((0, b_padded - B), (0, 0)))
    grid = (b_padded // tb,)

    flops = 2 * b_padded * (input_dim * hidden_dim + hidden_dim * out_pad)
    bytes_accessed = 4 * (b_padded * input_dim            # x read
                          + hidden_dim * input_dim + hidden_dim   # fc1 params
                          + out_pad * hidden_dim + out_pad        # fc2 params
                          + b_padded * out_pad)           # output write

    out = pl.pallas_call(
        _mlp_kernel,
        out_shape=jax.ShapeDtypeStruct((b_padded, out_pad), jnp.float32),
        grid_spec=pltpu.PrefetchScalarGridSpec(
            num_scalar_prefetch=0,
            grid=grid,
            in_specs=[
                pl.BlockSpec((tb, input_dim), lambda i: (i, 0)),
                pl.BlockSpec((hidden_dim, input_dim), lambda i: (0, 0)),
                pl.BlockSpec((1, hidden_dim), lambda i: (0, 0)),
                pl.BlockSpec((out_pad, hidden_dim), lambda i: (0, 0)),
                pl.BlockSpec((1, out_pad), lambda i: (0, 0)),
            ],
            out_specs=pl.BlockSpec((tb, out_pad), lambda i: (i, 0)),
        ),
        compiler_params=pltpu.CompilerParams(
            dimension_semantics=("parallel",),
            vmem_limit_bytes=vmem_limit_bytes,
        ),
        cost_estimate=pl.CostEstimate(
            flops=flops, transcendentals=0, bytes_accessed=bytes_accessed),
    )(x, w1, b1, w2p, b2p)

    return out[:B, :output_dim]


def custom_reward_learner_forward(x, fc1_w, fc1_b, fc2_w, fc2_b, **kw):
    """Convenience one-shot: prep (normally done once) + forward."""
    w1, b1, w2p, b2p, output_dim = prepare_params(fc1_w, fc1_b, fc2_w, fc2_b)
    return mlp_forward(x, w1, b1, w2p, b2p, output_dim, **kw)


def _reference_forward(x, fc1_w, fc1_b, fc2_w, fc2_b):
    h = jnp.maximum(x @ fc1_w.T + fc1_b, 0.0)
    return jnp.maximum(h @ fc2_w.T + fc2_b, 0.0)


if __name__ == "__main__":
    # Small shapes consistent with the module's __init__.
    batch = 8
    input_dim = 32
    hidden_dim = 32
    output_dim = 8

    key = jax.random.PRNGKey(0)
    k_x, k_w1, k_b1, k_w2, k_b2 = jax.random.split(key, 5)

    x = jax.random.normal(k_x, (batch, input_dim), dtype=jnp.float32)

    # Deterministic parameter init (mimics nn.Linear uniform(-1/sqrt(fan_in), +)).
    lim1 = 1.0 / jnp.sqrt(input_dim)
    lim2 = 1.0 / jnp.sqrt(hidden_dim)
    fc1_w = jax.random.uniform(k_w1, (hidden_dim, input_dim),
                               minval=-lim1, maxval=lim1, dtype=jnp.float32)
    fc1_b = jax.random.uniform(k_b1, (hidden_dim,),
                               minval=-lim1, maxval=lim1, dtype=jnp.float32)
    fc2_w = jax.random.uniform(k_w2, (output_dim, hidden_dim),
                               minval=-lim2, maxval=lim2, dtype=jnp.float32)
    fc2_b = jax.random.uniform(k_b2, (output_dim,),
                               minval=-lim2, maxval=lim2, dtype=jnp.float32)

    # One-time parameter prep (layout / lane padding), then the forward kernel.
    w1, b1, w2p, b2p, odim = prepare_params(fc1_w, fc1_b, fc2_w, fc2_b)
    out = mlp_forward(x, w1, b1, w2p, b2p, odim)
    out = jax.block_until_ready(out)

    ref = _reference_forward(x, fc1_w, fc1_b, fc2_w, fc2_b)
    assert out.shape == (batch, output_dim)
    assert jnp.allclose(out, ref, atol=1e-5, rtol=1e-5)

    # TODO(synk): training utilities (MSE loss, Adam step, target-network soft
    # update) are optimizer/host-side logic, not part of the forward kernel.
    # TODO(synk): for large-batch inference on v6e/v7x, cast x / weights to
    # bfloat16 at the call boundary (keep f32 accumulation) to halve HBM traffic.

    print("KERNEL_OK")
</pallas_src>

<mosaic_0001>
module attributes {stable_mosaic.version = 11 : i64} {
  func.func @_mlp_kernel(%arg0: i32, %arg1: memref<8x32xf32, #tpu.memory_space<vmem>>, %arg2: memref<32x32xf32, #tpu.memory_space<vmem>>, %arg3: memref<1x32xf32, #tpu.memory_space<vmem>>, %arg4: memref<128x32xf32, #tpu.memory_space<vmem>>, %arg5: memref<1x128xf32, #tpu.memory_space<vmem>>, %arg6: memref<8x128xf32, #tpu.memory_space<vmem>>) attributes {dimension_semantics = [#tpu.dimension_semantics<parallel>], iteration_bounds = array<i64: 1>, scalar_prefetch = 0 : i64, scratch_operands = 0 : i64, tpu.core_type = #tpu.core_type<tc>, window_params = [{transform_indices = @transform_0, window_bounds = array<i64: 8, 32>}, {pipeline_mode = #tpu.pipeline_mode<synchronous>, transform_indices = @transform_1, window_bounds = array<i64: 32, 32>}, {pipeline_mode = #tpu.pipeline_mode<synchronous>, transform_indices = @transform_2, window_bounds = array<i64: 1, 32>}, {pipeline_mode = #tpu.pipeline_mode<synchronous>, transform_indices = @transform_3, window_bounds = array<i64: 128, 32>}, {pipeline_mode = #tpu.pipeline_mode<synchronous>, transform_indices = @transform_4, window_bounds = array<i64: 1, 128>}, {transform_indices = @transform_5, window_bounds = array<i64: 8, 128>}]} {
    %c0 = arith.constant 0 : index
    %c0_0 = arith.constant 0 : index
    %0 = vector.load %arg1[%c0, %c0_0] : memref<8x32xf32, #tpu.memory_space<vmem>>, vector<8x32xf32>
    %c0_1 = arith.constant 0 : index
    %c0_2 = arith.constant 0 : index
    %1 = vector.load %arg2[%c0_1, %c0_2] : memref<32x32xf32, #tpu.memory_space<vmem>>, vector<32x32xf32>
    %cst = arith.constant dense<0.000000e+00> : vector<8x32xf32>
    %2 = tpu.matmul %0, %1, %cst {dimension_numbers = #tpu.dot_dimension_numbers<[1], [1], [0], [0], [0, 0, 1, 0], [], []>} : vector<8x32xf32>, vector<32x32xf32>, vector<8x32xf32> -> vector<8x32xf32>
    %c0_3 = arith.constant 0 : index
    %c0_4 = arith.constant 0 : index
    %3 = vector.load %arg3[%c0_3, %c0_4] : memref<1x32xf32, #tpu.memory_space<vmem>>, vector<1x32xf32>
    %4 = vector.broadcast %3 : vector<1x32xf32> to vector<8x32xf32>
    %5 = arith.addf %2, %4 : vector<8x32xf32>
    %cst_5 = arith.constant 0.000000e+00 : f32
    %6 = vector.broadcast %cst_5 : f32 to vector<8x32xf32>
    %7 = arith.maximumf %5, %6 : vector<8x32xf32>
    %c0_6 = arith.constant 0 : index
    %c0_7 = arith.constant 0 : index
    %8 = vector.load %arg4[%c0_6, %c0_7] : memref<128x32xf32, #tpu.memory_space<vmem>>, vector<128x32xf32>
    %cst_8 = arith.constant dense<0.000000e+00> : vector<8x128xf32>
    %9 = tpu.matmul %7, %8, %cst_8 {dimension_numbers = #tpu.dot_dimension_numbers<[1], [1], [0], [0], [0, 0, 1, 0], [], []>} : vector<8x32xf32>, vector<128x32xf32>, vector<8x128xf32> -> vector<8x128xf32>
    %c0_9 = arith.constant 0 : index
    %c0_10 = arith.constant 0 : index
    %10 = vector.load %arg5[%c0_9, %c0_10] : memref<1x128xf32, #tpu.memory_space<vmem>>, vector<1x128xf32>
    %11 = vector.broadcast %10 : vector<1x128xf32> to vector<8x128xf32>
    %12 = arith.addf %9, %11 : vector<8x128xf32>
    %cst_11 = arith.constant 0.000000e+00 : f32
    %13 = vector.broadcast %cst_11 : f32 to vector<8x128xf32>
    %14 = arith.maximumf %12, %13 : vector<8x128xf32>
    %c0_12 = arith.constant 0 : index
    %c0_13 = arith.constant 0 : index
    %15 = vector.load %arg6[%c0_12, %c0_13] : memref<8x128xf32, #tpu.memory_space<vmem>>, vector<8x128xf32>
    tpu.vector_store %arg6[%c0_12, %c0_13], %14 {strides = array<i32>} : memref<8x128xf32, #tpu.memory_space<vmem>>, vector<8x128xf32>,
    return
  }
  func.func @transform_0(%arg0: i32) -> (i32, i32) {
    %c0_i32 = arith.constant 0 : i32
    %c0_i32_0 = arith.constant 0 : i32
    return %arg0, %c0_i32 : i32, i32
  }
  func.func @transform_1(%arg0: i32) -> (i32, i32) {
    %c0_i32 = arith.constant 0 : i32
    %c0_i32_0 = arith.constant 0 : i32
    %c0_i32_1 = arith.constant 0 : i32
    return %c0_i32, %c0_i32_0 : i32, i32
  }
  func.func @transform_2(%arg0: i32) -> (i32, i32) {
    %c0_i32 = arith.constant 0 : i32
    %c0_i32_0 = arith.constant 0 : i32
    %c0_i32_1 = arith.constant 0 : i32
    return %c0_i32, %c0_i32_0 : i32, i32
  }
  func.func @transform_3(%arg0: i32) -> (i32, i32) {
    %c0_i32 = arith.constant 0 : i32
    %c0_i32_0 = arith.constant 0 : i32
    %c0_i32_1 = arith.constant 0 : i32
    return %c0_i32, %c0_i32_0 : i32, i32
  }
  func.func @transform_4(%arg0: i32) -> (i32, i32) {
    %c0_i32 = arith.constant 0 : i32
    %c0_i32_0 = arith.constant 0 : i32
    %c0_i32_1 = arith.constant 0 : i32
    return %c0_i32, %c0_i32_0 : i32, i32
  }
  func.func @transform_5(%arg0: i32) -> (i32, i32) {
    %c0_i32 = arith.constant 0 : i32
    %c0_i32_0 = arith.constant 0 : i32
    return %arg0, %c0_i32 : i32, i32
  }
}

</mosaic_0001>

<bundles_post_ra>
// kernel: tpu_custom_call.1
= control target key start
LH: loop header
LB: loop body
LE: loop exit
PB: predicated region body
PF: predicated region fallthrough
CT: control target
= control target key end

     0   :  { %vm33_vm0 = vcmask 261120   ;;  %v440_v2 = vmov 0.0|0.0   ;;  %vm441_vm2 = vmmov 0   ;;  %v442_v5 = vmov 0.0   ;;  %s583_s0 = inlined_call_operand.vmem [shape: f32[8,32], index: 0, kind: input, shape index: {}]   ;;  %s584_s1 = inlined_call_operand.vmem [shape: f32[32,32], index: 1, kind: input, shape index: {}]   ;;  %s585_s2 = inlined_call_operand.vmem [shape: f32[1,32], index: 2, kind: input, shape index: {}]   ;;  %s586_s3 = inlined_call_operand.vmem [shape: f32[128,32], index: 3, kind: input, shape index: {}]   ;;  %s587_s4 = inlined_call_operand.vmem [shape: f32[1,128], index: 4, kind: input, shape index: {}]   ;;  %s588_s5 = inlined_call_operand.hbm [shape: f32[8,128], index: 5, kind: output, shape index: {}]  }
   0x1   :  { %v22_v0 = vld [vmem:[%s584_s1] sm:$0xff]  ;;  %v23_v1 = vld [vmem:[%s584_s1 + $0x8] sm:$0xff]  ;;  %372 = vmatprep.subr.bf16.mxu0 %v440_v2  ;;  %vm482_vm1 = vmpackc.low %vm33_vm0, %vm33_vm0  ;;  %380 = vmatprep.subr.bf16.mxu1 %v440_v2 }
   0x2   :  { %v373_v3 = vpack.c.bf16 %v23_v1, %v22_v0  ;;  %334 = vmatprep.mubr.msk.f32.mxu0 %vm441_vm2, %v442_v5  ;;  %v120_v6 = vld [vmem:[%s586_s3] sm:$0xff]  ;;  %v121_v7 = vld [vmem:[%s586_s3 + $0x8] sm:$0xff]  ;;  %369 = vmatprep.mubr.msk.f32.mxu1 %vm441_vm2, %v442_v5  ;;  %v24_v9 = vld [vmem:[%s584_s1 + $0x10] sm:$0xff] }
   0x3   :  { %v381_v8 = vpack.c.bf16 %v121_v7, %v120_v6  ;;  %v25_v10 = vld [vmem:[%s584_s1 + $0x18] sm:$0xff]  ;;  %v122_v11 = vld [vmem:[%s586_s3 + $0x10] sm:$0xff] }
   0x4   :  { %375 = vmatpush3.bf16.xpose.msk.msra.mxu0 %vm482_vm1, %v373_v3  ;;  %v123_v12 = vld [vmem:[%s586_s3 + $0x18] sm:$0xff]  ;;  %v377_v13 = vpack.c.bf16 %v25_v10, %v24_v9 }
   0x5   :  { %376 = vmatprep.subr.bf16.mxu0 %v440_v2  ;;  %383 = vmatpush3.bf16.xpose.msk.msra.mxu1 %vm482_vm1, %v381_v8 }
   0x6   :  { %384 = vmatprep.subr.bf16.mxu1 %v440_v2 }
   0x7   :  { %10 = vsyncpa [#allocation3], 0  ;;  %v385_v14 = vpack.c.bf16 %v123_v12, %v122_v11  ;;  %v124_v15 = vld [vmem:[%s586_s3 + $0x20] sm:$0xff]  ;;  %v125_v16 = vld [vmem:[%s586_s3 + $0x28] sm:$0xff] }
   0x8   :  { %v21_v17 = vld [vmem:[%s583_s0] sm:$0xff]  ;;  %v389_v18 = vpack.c.bf16 %v125_v16, %v124_v15  ;;  %v126_v19 = vld [vmem:[%s586_s3 + $0x30] sm:$0xff]  ;;  %v127_v20 = vld [vmem:[%s586_s3 + $0x38] sm:$0xff] }
   0x9   :  { %v393_v21 = vpack.c.bf16 %v127_v20, %v126_v19  ;;  %v128_v22 = vld [vmem:[%s586_s3 + $0x40] sm:$0xff]  ;;  %v129_v23 = vld [vmem:[%s586_s3 + $0x48] sm:$0xff]  ;;  %v130_v25 = vld [vmem:[%s586_s3 + $0x50] sm:$0xff] }
   0xa   :  { %v397_v24 = vpack.c.bf16 %v129_v23, %v128_v22  ;;  %v131_v26 = vld [vmem:[%s586_s3 + $0x58] sm:$0xff]  ;;  %v132_v28 = vld [vmem:[%s586_s3 + $0x60] sm:$0xff]  ;;  %v133_v29 = vld [vmem:[%s586_s3 + $0x68] sm:$0xff] }
   0xb   :  { %v401_v27 = vpack.c.bf16 %v131_v26, %v130_v25  ;;  %v405_v30 = vpack.c.bf16 %v133_v29, %v132_v28  ;;  %v134_v31 = vld [vmem:[%s586_s3 + $0x70] sm:$0xff]  ;;  %v135_v32 = vld [vmem:[%s586_s3 + $0x78] sm:$0xff]  ;;  %v280_v34 = vld [vmem:[%s585_s2] ss:$0 sm:$0xff]  ;;  %s443_s3 = smov [#allocation2]  }
   0xc   :  { %379 = vmatpush3.bf16.xpose.msk.msra.mxu0 %vm482_vm1, %v377_v13  ;;  %v409_v33 = vpack.c.bf16 %v135_v32, %v134_v31  ;;  %v286_v39 = vld [vmem:[%s587_s4] ss:$0 sm:$0xff]  ;;  %s272_s11 = sshll.u32 %s443_s3, 4  ;;  %s273_s11 = int_to_ptr.vmem [resolvable:$true] %s272_s11 }
   0xd   :  { %387 = vmatpush3.bf16.xpose.msk.msra.mxu1 %vm482_vm1, %v385_v14  ;;  %s416_s12 = scalar_lea.vmem %s273_s11, 128  ;;  %p421_p1 = scmp.lt.s32.totalorder %s273_s11, %s273_s11 }
   0xe   :  { %388 = vmatprep.subr.bf16.mxu1 %v440_v2  ;;  %p417_p0 = scmp.ne.s32.totalorder %s273_s11, %s416_s12  ;;  %p422_p2 = scmp.lt.s32.totalorder %s416_s12, %s416_s12 }
  0x10   :  { %p423_p3 = por %p422_p2, %p421_p1 }
  0x12   :  { %p424_p4 = pnand %p423_p3, %p417_p0 }
  0x13   :  { %335 = vmatmul.mubr.msk.f32.vlgmr.msra.gmra.mrb[0].mxu0 %vm33_vm0, %v21_v17 }
  0x15   :  { %391 = vmatpush3.bf16.xpose.msk.msra.mxu1 %vm482_vm1, %v389_v18 }
  0x16   :  { %392 = vmatprep.subr.bf16.mxu1 %v440_v2 }
  0x1d   :  { %395 = vmatpush3.bf16.xpose.msk.msra.mxu1 %vm482_vm1, %v393_v21 }
  0x1e   :  { %396 = vmatprep.subr.bf16.mxu1 %v440_v2 }
  0x25   :  { %399 = vmatpush3.bf16.xpose.msk.msra.mxu1 %vm482_vm1, %v397_v24 }
  0x26   :  { %400 = vmatprep.subr.bf16.mxu1 %v440_v2 }
  0x2d   :  { %403 = vmatpush3.bf16.xpose.msk.msra.mxu1 %vm482_vm1, %v401_v27 }
  0x2e   :  { %404 = vmatprep.subr.bf16.mxu1 %v440_v2 }
  0x35   :  { %407 = vmatpush3.bf16.xpose.msk.msra.mxu1 %vm482_vm1, %v405_v30 }
  0x36   :  { %408 = vmatprep.subr.bf16.mxu1 %v440_v2 }
  0x3d   :  { %411 = vmatpush3.bf16.xpose.msk.msra.mxu1 %vm482_vm1, %v409_v33 }
  0xe6   :  { %v115_v35 = vpop.f32.mrb[0].mxu0 }
  0xe7   :  { %v116_v36 = vadd.f32 %v280_v34, %v115_v35  ;;  %v336_v37 = vpop.f32.mrb[1].mxu0 }
  0xe9   :  { %v119_v38 = vmax.f32 %v116_v36, 0.0 }
  0xeb   :  { %370 = vmatmul.mubr.msk.f32.vlgmr.msra.gmra.mrb[0].mxu1 %vm33_vm0, %v119_v38 }
 0x1be   :  { %v260_v40 = vpop.f32.mrb[0].mxu1 }
 0x1bf   :  { %v261_v41 = vadd.f32 %v286_v39, %v260_v40  ;;  %v371_v42 = vpop.f32.mrb[1].mxu1 }
 0x1c1   :  { %v264_v43 = vmax.f32 %v261_v41, 0.0 }
 0x1c3   :  { %265 = vst [vmem:[#allocation2] sm:$0xff] %v264_v43 }
 0x1c4   :  { %427 = shalt.err (!%p424_p4)
}
 0x1c5   :  { %s428_s14 = scalar_lea.hbm %s588_s5, 128 }
 0x1c6   :  { %p429_p5 = scmp.ne.s32.totalorder %s588_s5, %s428_s14  ;;  %p432_p6 = scmp.lt.u32.totalorder %s428_s14, %s588_s5 }
 0x1c8   :  { %p434_p7 = pnand %p432_p6, %p429_p5 }
 0x1ca   :  { %437 = shalt.err (!%p434_p7)
}
 0x1cb   :  { %275 = dma.vmem_to_hbm [thread:$0]  %s273_s11, 128, %s588_s5, [#allocation3]  }
 0x1cc   :  { %438 = dma.done.wait [#allocation3], 128  }
 0x1cd   :  { %439 = vsyncadd [#allocation3], 4294967168 }
 0x1ce   :  { %279 = vsyncpa [#allocation3], 1 }

</bundles_post_ra>
